<compile_context>
chip_gen: v7x
topology: tpu7x:2x2x1
jax: 0.10.0
libtpu: 0.0.40
codegen_flags: <defaults>
</compile_context>

<pallas_src>
import functools
from dataclasses import dataclass, field

import jax
import jax.numpy as jnp
from jax.experimental import pallas as pl
from jax.experimental.pallas import tpu as pltpu


_LANE = 128
_SUBLANE = 8
_TARGET_BLOCK_BYTES = 4 * 1024 * 1024    # ~4 MiB per input block (v7x roofline)
_MAX_BLOCK_ROWS = 2048


def _cdiv(a, b):
    return -(-a // b)


def _vmem_limit(estimate_bytes):
    # Scoped-VMEM request sized from the actual footprint (+ slack for
    # compiler temporaries), clamped well below v7x's 64 MiB physical VMEM.
    return int(min(max(estimate_bytes + (2 << 20), 8 << 20), 48 << 20))


def _as_2d(a):
    """Free (contiguous) reshape to a lane-friendly 2D view — no pad, no copy."""
    t = int(a.size)
    for c in (512, 256, 128):
        if t >= c and t % c == 0:
            return a.reshape(t // c, c)
    if a.ndim >= 2:
        return a.reshape(-1, a.shape[-1])
    return a.reshape(1, max(t, 1))


def _plan(rows, block_rows):
    nblocks = _cdiv(rows, block_rows)
    # Megacore split (v7x) only when it divides evenly -> never addresses an
    # out-of-range block; harmless on single-TC v5e/v6e.
    num_chunks = 2 if (nblocks >= 2 and nblocks % 2 == 0) else 1
    return nblocks, num_chunks, nblocks // num_chunks


# ----------------------------------------------------------------------------
# Elementwise losses: smooth_l1 / mse / huber  (reduction='mean')
# ----------------------------------------------------------------------------
def _elementwise_loss_kernel(x_ref, y_ref, out_ref, acc_ref, *,
                             kind, beta, rows, block_rows, bpc, mask_rows):
    j = pl.program_id(1)

    @pl.when(j == 0)
    def _():
        acc_ref[...] = jnp.zeros_like(acc_ref)

    d = x_ref[...].astype(jnp.float32) - y_ref[...].astype(jnp.float32)
    if kind == 'mse':
        val = d * d
    elif kind == 'smooth_l1':
        ad = jnp.abs(d)
        if beta == 0.0:
            # PyTorch: beta == 0 degenerates to pure L1 loss.
            val = ad
        else:
            # 0.5*d^2/beta if |d| < beta else |d| - 0.5*beta (divide hoisted).
            val = jnp.where(ad < beta, (0.5 / beta) * (d * d), ad - 0.5 * beta)
    elif kind == 'huber':
        ad = jnp.abs(d)
        val = jnp.where(ad <= beta, 0.5 * (d * d), beta * (ad - 0.5 * beta))
    else:
        raise ValueError(f'Unknown elementwise loss kind: {kind}')

    if mask_rows:
        # Ragged tail: rows past the true extent carry garbage from the
        # clamped DMA -> select them to exactly 0 (a couple of VPU passes).
        p = pl.program_id(0)
        row0 = (p * bpc + j) * block_rows
        rid = jax.lax.broadcasted_iota(jnp.int32, (block_rows, 1), 0) + row0
        val = jnp.where(rid < rows, val, 0.0)

    acc_rows = acc_ref.shape[0]
    if acc_rows == block_rows:
        acc_ref[...] += val
    else:
        # Fold sublane groups with pure vreg-wise VPU adds (no XLU, no
        # full-tile accumulator read/write per step).
        acc_ref[...] += val.reshape(block_rows // acc_rows, acc_rows, -1).sum(axis=0)

    @pl.when(j == pl.num_programs(1) - 1)
    def _():
        # Single cross-lane/sublane reduce per chunk, once, in the epilogue.
        out_ref[...] = jnp.zeros_like(out_ref) + jnp.sum(acc_ref[...])


def elementwise_loss(x, y, *, kind, beta=1.0, max_block_rows=_MAX_BLOCK_ROWS):
    x = jnp.asarray(x)
    y = jnp.asarray(y)
    total = int(x.size)
    x2 = _as_2d(x)                     # native dtype, free reshape (no upcast, no pad)
    y2 = jnp.asarray(y).reshape(x2.shape)
    rows, cols = x2.shape
    itemsize = max(jnp.dtype(x2.dtype).itemsize, jnp.dtype(y2.dtype).itemsize)

    br = _TARGET_BLOCK_BYTES // max(1, cols * itemsize)
    br = max(_SUBLANE, min(int(max_block_rows), (br // _SUBLANE) * _SUBLANE))
    block_rows = rows if rows <= br else br
    nblocks, num_chunks, bpc = _plan(rows, block_rows)
    mask_rows = (nblocks * block_rows != rows)
    acc_rows = _SUBLANE if block_rows % _SUBLANE == 0 else block_rows

    kernel = functools.partial(
        _elementwise_loss_kernel, kind=kind, beta=float(beta),
        rows=rows, block_rows=block_rows, bpc=bpc, mask_rows=mask_rows)

    vmem = _vmem_limit(2 * 2 * block_rows * cols * itemsize     # 2 inputs, double-buffered
                       + 4 * block_rows * cols * 4              # f32 temporaries
                       + acc_rows * cols * 4)                   # accumulator

    in_map = lambda p, j: (p * bpc + j, 0)
    partials = pl.pallas_call(
        kernel,
        out_shape=jax.ShapeDtypeStruct((num_chunks, 1, _LANE), jnp.float32),
        grid_spec=pltpu.PrefetchScalarGridSpec(
            num_scalar_prefetch=0,
            grid=(num_chunks, bpc),
            in_specs=[
                pl.BlockSpec((block_rows, cols), in_map),
                pl.BlockSpec((block_rows, cols), in_map),
            ],
            out_specs=pl.BlockSpec((1, 1, _LANE), lambda p, j: (p, 0, 0)),
            scratch_shapes=[pltpu.VMEM((acc_rows, cols), jnp.float32)],
        ),
        compiler_params=pltpu.CompilerParams(
            dimension_semantics=("parallel", "arbitrary"),
            vmem_limit_bytes=vmem),
    )(x2, y2)
    return jnp.sum(partials[:, 0, 0]) / float(total)


# ----------------------------------------------------------------------------
# Cross-entropy (class-index targets, reduction='mean', no class weights)
# ----------------------------------------------------------------------------
def _cross_entropy_kernel(logits_ref, tgt_ref, out_ref, acc_ref, *,
                          n, block_rows, bpc, mask_rows):
    j = pl.program_id(1)

    @pl.when(j == 0)
    def _():
        acc_ref[...] = jnp.zeros_like(acc_ref)

    z = logits_ref[...].astype(jnp.float32)                       # (TM, C)
    m = jnp.max(z, axis=-1, keepdims=True)
    z = z - m
    lse = jnp.log(jnp.sum(jnp.exp(z), axis=-1, keepdims=True))    # (TM, 1)

    cls = jax.lax.broadcasted_iota(jnp.int32, z.shape, 1)
    pick = cls == tgt_ref[...]                                    # (TM, C); tgt (TM, 1) broadcasts
    if mask_rows:
        p = pl.program_id(0)
        row0 = (p * bpc + j) * block_rows
        rid = jax.lax.broadcasted_iota(jnp.int32, (block_rows, 1), 0) + row0
        pick = jnp.logical_and(pick, rid < n)

    # -log p[target] = lse - z[target]; exactly one picked column per valid
    # row, so the fold below recovers the per-row NLL without building a
    # full log-softmax or one-hot product.
    tile = jnp.where(pick, lse - z, 0.0)                          # (TM, C)

    acc_rows = acc_ref.shape[0]
    if acc_rows == block_rows:
        acc_ref[...] += tile
    else:
        acc_ref[...] += tile.reshape(block_rows // acc_rows, acc_rows, -1).sum(axis=0)

    @pl.when(j == pl.num_programs(1) - 1)
    def _():
        out_ref[...] = jnp.zeros_like(out_ref) + jnp.sum(acc_ref[...])


def cross_entropy_loss(logits, targets, *, max_block_rows=_MAX_BLOCK_ROWS):
    # TODO(synk): class weights / ignore_index / label smoothing / non-'mean'
    # reductions of torch.nn.CrossEntropyLoss are not implemented.
    # TODO(synk): pack k=128//C samples into the lane dim for tiny class counts,
    # and add a class-axis online-softmax grid dimension for very large vocabularies.
    logits = jnp.asarray(logits)                                  # keep native dtype
    n, c = logits.shape
    tgt2d = jnp.asarray(targets, jnp.int32).reshape(n, 1)
    itemsize = jnp.dtype(logits.dtype).itemsize

    br = min(int(max_block_rows), _TARGET_BLOCK_BYTES // max(1, c * itemsize))
    br = max(_LANE, (br // _LANE) * _LANE)      # multiple of 128 keeps all BlockSpecs legal
    block_rows = n if n <= br else br
    nblocks, num_chunks, bpc = _plan(n, block_rows)
    mask_rows = (nblocks * block_rows != n)
    acc_rows = _SUBLANE if block_rows % _SUBLANE == 0 else block_rows

    kernel = functools.partial(_cross_entropy_kernel, n=n, block_rows=block_rows,
                               bpc=bpc, mask_rows=mask_rows)

    vmem = _vmem_limit(2 * block_rows * c * itemsize              # logits, double-buffered
                       + 2 * block_rows * _LANE * 4               # (padded) target blocks
                       + 5 * block_rows * c * 4                   # f32 temporaries
                       + acc_rows * c * 4)

    in_map = lambda p, j: (p * bpc + j, 0)
    partials = pl.pallas_call(
        kernel,
        out_shape=jax.ShapeDtypeStruct((num_chunks, 1, _LANE), jnp.float32),
        grid_spec=pltpu.PrefetchScalarGridSpec(
            num_scalar_prefetch=0,
            grid=(num_chunks, bpc),
            in_specs=[
                pl.BlockSpec((block_rows, c), in_map),
                pl.BlockSpec((block_rows, 1), in_map),
            ],
            out_specs=pl.BlockSpec((1, 1, _LANE), lambda p, j: (p, 0, 0)),
            scratch_shapes=[pltpu.VMEM((acc_rows, c), jnp.float32)],
        ),
        compiler_params=pltpu.CompilerParams(
            dimension_semantics=("parallel", "arbitrary"),
            vmem_limit_bytes=vmem),
    )(logits, tgt2d)
    return jnp.sum(partials[:, 0, 0]) / float(n)


# ----------------------------------------------------------------------------
# Loss wrapper mirroring the PyTorch module
# ----------------------------------------------------------------------------
class Loss:

    @dataclass
    class Configuration:
        kind: str
        parameters: dict = field(default_factory=dict)

    def __init__(self, configuration: 'Loss.Configuration'):
        self.configuration = configuration
        kind = configuration.kind
        params = dict(configuration.parameters or {})
        reduction = params.pop('reduction', 'mean')
        if reduction != 'mean':
            # TODO(synk): only reduction='mean' (the torch default) is implemented.
            raise NotImplementedError(f'reduction={reduction!r} not supported')
        match kind:
            case 'smooth_l1':
                beta = params.get('beta', 1.0)
                self._fn = lambda x, y: elementwise_loss(x, y, kind='smooth_l1', beta=beta)
            case 'mse':
                self._fn = lambda x, y: elementwise_loss(x, y, kind='mse')
            case 'huber':
                delta = params.get('delta', 1.0)
                self._fn = lambda x, y: elementwise_loss(x, y, kind='huber', beta=delta)
            case 'cross_entropy':
                self._fn = lambda logits, targets: cross_entropy_loss(logits, targets)
            case _:
                raise ValueError(f'Unknown loss kind: {kind}')

    def __call__(self, *args):
        return self._fn(*args)

    @staticmethod
    def from_cli(parameters):
        return Loss(Loss.Configuration(
            kind=parameters['kind'],
            parameters=parameters.get('parameters', dict())))


# ----------------------------------------------------------------------------
# Pure-JAX references for validation
# ----------------------------------------------------------------------------
def _ref_smooth_l1(x, y, beta=1.0):
    d = x.astype(jnp.float32) - y.astype(jnp.float32)
    ad = jnp.abs(d)
    if beta == 0.0:
        return jnp.mean(ad)
    return jnp.mean(jnp.where(ad < beta, 0.5 * d * d / beta, ad - 0.5 * beta))


def _ref_mse(x, y):
    d = x.astype(jnp.float32) - y.astype(jnp.float32)
    return jnp.mean(d * d)


def _ref_huber(x, y, delta=1.0):
    d = x.astype(jnp.float32) - y.astype(jnp.float32)
    ad = jnp.abs(d)
    return jnp.mean(jnp.where(ad <= delta, 0.5 * d * d, delta * (ad - 0.5 * delta)))


def _ref_cross_entropy(logits, targets):
    lp = jax.nn.log_softmax(logits.astype(jnp.float32), axis=-1)
    return -jnp.mean(jnp.take_along_axis(lp, targets[:, None].astype(jnp.int32), axis=-1))


if __name__ == "__main__":
    key = jax.random.PRNGKey(0)
    keys = jax.random.split(key, 14)

    # Elementwise-loss inputs: predictions / targets.
    x = jax.random.normal(keys[0], (16, 256), dtype=jnp.float32)
    y = jax.random.normal(keys[1], (16, 256), dtype=jnp.float32)

    # Ragged shape exercising the no-pad / full-dim-block path.
    xr = jax.random.normal(keys[2], (5, 37), dtype=jnp.float32)
    yr = jax.random.normal(keys[3], (5, 37), dtype=jnp.float32)

    # Half-precision inputs exercising the native-dtype DMA path.
    xb = jax.random.normal(keys[4], (16, 256), dtype=jnp.float32).astype(jnp.bfloat16)
    yb = jax.random.normal(keys[5], (16, 256), dtype=jnp.float32).astype(jnp.bfloat16)

    # Cross-entropy inputs: (N, C) logits + int class targets.
    logits = jax.random.normal(keys[6], (16, 32), dtype=jnp.float32)
    targets = jax.random.randint(keys[7], (16,), 0, 32, dtype=jnp.int32)
    logits_r = jax.random.normal(keys[8], (10, 32), dtype=jnp.float32)
    targets_r = jax.random.randint(keys[9], (10,), 0, 32, dtype=jnp.int32)

    checks = []

    loss = Loss.from_cli({'kind': 'smooth_l1', 'parameters': {'beta': 0.75}})
    checks.append((loss(x, y), _ref_smooth_l1(x, y, beta=0.75)))

    loss = Loss.from_cli({'kind': 'mse'})
    checks.append((loss(x, y), _ref_mse(x, y)))
    checks.append((loss(xr, yr), _ref_mse(xr, yr)))
    checks.append((loss(xb, yb), _ref_mse(xb, yb)))

    loss = Loss.from_cli({'kind': 'huber', 'parameters': {'delta': 1.5}})
    checks.append((loss(x, y), _ref_huber(x, y, delta=1.5)))

    loss = Loss.from_cli({'kind': 'cross_entropy'})
    checks.append((loss(logits, targets), _ref_cross_entropy(logits, targets)))
    checks.append((loss(logits_r, targets_r), _ref_cross_entropy(logits_r, targets_r)))

    # Extra coverage at small shapes: multi-block grids, in-kernel tail
    # masking, sublane-fold accumulator and the 2-chunk parallel split
    # (forced via a reduced block-row cap).
    xm = jax.random.normal(keys[10], (60, 512), dtype=jnp.float32)
    ym = jax.random.normal(keys[11], (60, 512), dtype=jnp.float32)
    checks.append((elementwise_loss(xm, ym, kind='mse', max_block_rows=16),
                   _ref_mse(xm, ym)))
    checks.append((elementwise_loss(xm[:36], ym[:36], kind='huber', beta=1.0,
                                    max_block_rows=8),
                   _ref_huber(xm[:36], ym[:36], delta=1.0)))

    lm = jax.random.normal(keys[12], (300, 32), dtype=jnp.float32)
    tm = jax.random.randint(keys[13], (300,), 0, 32, dtype=jnp.int32)
    checks.append((cross_entropy_loss(lm, tm, max_block_rows=128),
                   _ref_cross_entropy(lm, tm)))
    checks.append((cross_entropy_loss(lm[:256], tm[:256], max_block_rows=128),
                   _ref_cross_entropy(lm[:256], tm[:256])))

    for got, ref in checks:
        got = jax.block_until_ready(got)
        assert jnp.allclose(got, ref, rtol=1e-5, atol=1e-5), (got, ref)

    print("KERNEL_OK")
</pallas_src>

<mosaic_0001>
module attributes {stable_mosaic.version = 11 : i64} {
  func.func @_elementwise_loss_kernel(%arg0: i32, %arg1: i32, %arg2: memref<8x512xf32, #tpu.memory_space<vmem>>, %arg3: memref<8x512xf32, #tpu.memory_space<vmem>>, %arg4: memref<1x1x128xf32, #tpu.memory_space<vmem>>, %arg5: memref<8x512xf32, #tpu.memory_space<vmem>>) attributes {dimension_semantics = [#tpu.dimension_semantics<parallel>, #tpu.dimension_semantics<arbitrary>], iteration_bounds = array<i64: 1, 1>, scalar_prefetch = 0 : i64, scratch_operands = 1 : i64, tpu.core_type = #tpu.core_type<tc>, window_params = [{transform_indices = @transform_0, window_bounds = array<i64: 8, 512>}, {transform_indices = @transform_1, window_bounds = array<i64: 8, 512>}, {transform_indices = @transform_2, window_bounds = array<i64: 1, 1, 128>}]} {
    %c0_i32 = arith.constant 0 : i32
    %0 = arith.cmpi eq, %arg1, %c0_i32 : i32
    %1 = arith.extui %0 : i1 to i32
    %c0_i32_0 = arith.constant 0 : i32
    %2 = arith.cmpi ne, %1, %c0_i32_0 : i32
    scf.if %2 {
      %cst_12 = arith.constant 0.000000e+00 : f32
      %21 = vector.broadcast %cst_12 : f32 to vector<8x512xf32>
      %c0_13 = arith.constant 0 : index
      %c0_14 = arith.constant 0 : index
      %22 = vector.load %arg5[%c0_13, %c0_14] : memref<8x512xf32, #tpu.memory_space<vmem>>, vector<8x512xf32>
      tpu.vector_store %arg5[%c0_13, %c0_14], %21 {strides = array<i32>} : memref<8x512xf32, #tpu.memory_space<vmem>>, vector<8x512xf32>,
    } else {
    }
    %c0 = arith.constant 0 : index
    %c0_1 = arith.constant 0 : index
    %3 = vector.load %arg2[%c0, %c0_1] : memref<8x512xf32, #tpu.memory_space<vmem>>, vector<8x512xf32>
    %c0_2 = arith.constant 0 : index
    %c0_3 = arith.constant 0 : index
    %4 = vector.load %arg3[%c0_2, %c0_3] : memref<8x512xf32, #tpu.memory_space<vmem>>, vector<8x512xf32>
    %5 = arith.subf %3, %4 : vector<8x512xf32>
    %6 = math.absf %5 : vector<8x512xf32>
    %cst = arith.constant 7.500000e-01 : f32
    %7 = vector.broadcast %cst : f32 to vector<8x512xf32>
    %8 = arith.cmpf olt, %6, %7 : vector<8x512xf32>
    %9 = arith.mulf %5, %5 : vector<8x512xf32>
    %cst_4 = arith.constant 0.666666686 : f32
    %10 = vector.broadcast %cst_4 : f32 to vector<8x512xf32>
    %11 = arith.mulf %10, %9 : vector<8x512xf32>
    %cst_5 = arith.constant 3.750000e-01 : f32
    %12 = vector.broadcast %cst_5 : f32 to vector<8x512xf32>
    %13 = arith.subf %6, %12 : vector<8x512xf32>
    %14 = arith.select %8, %11, %13 : vector<8x512xi1>, vector<8x512xf32>
    %c0_6 = arith.constant 0 : index
    %c0_7 = arith.constant 0 : index
    %15 = vector.load %arg5[%c0_6, %c0_7] : memref<8x512xf32, #tpu.memory_space<vmem>>, vector<8x512xf32>
    %16 = arith.addf %15, %14 : vector<8x512xf32>
    %c0_8 = arith.constant 0 : index
    %c0_9 = arith.constant 0 : index
    %17 = vector.load %arg5[%c0_8, %c0_9] : memref<8x512xf32, #tpu.memory_space<vmem>>, vector<8x512xf32>
    tpu.vector_store %arg5[%c0_8, %c0_9], %16 {strides = array<i32>} : memref<8x512xf32, #tpu.memory_space<vmem>>, vector<8x512xf32>,
    %c0_i32_10 = arith.constant 0 : i32
    %18 = arith.cmpi eq, %arg1, %c0_i32_10 : i32
    %19 = arith.extui %18 : i1 to i32
    %c0_i32_11 = arith.constant 0 : i32
    %20 = arith.cmpi ne, %19, %c0_i32_11 : i32
    scf.if %20 {
      %cst_12 = arith.constant 0.000000e+00 : f32
      %21 = vector.broadcast %cst_12 : f32 to vector<1x1x128xf32>
      %c0_13 = arith.constant 0 : index
      %c0_14 = arith.constant 0 : index
      %22 = vector.load %arg5[%c0_13, %c0_14] : memref<8x512xf32, #tpu.memory_space<vmem>>, vector<8x512xf32>
      %23 = vector.shape_cast %22 : vector<8x512xf32> to vector<1x8x512xf32>
      %cst_15 = arith.constant dense<0.000000e+00> : vector<1xf32>
      %24 = vector.multi_reduction <add>, %23, %cst_15 [1, 2] : vector<1x8x512xf32> to vector<1xf32>
      %25 = vector.shape_cast %24 : vector<1xf32> to vector<1x1x1xf32>
      %26 = vector.extract %25[0, 0, 0] : f32 from vector<1x1x1xf32>
      %27 = vector.broadcast %26 : f32 to vector<1x1x128xf32>
      %28 = arith.addf %21, %27 : vector<1x1x128xf32>
      %c0_16 = arith.constant 0 : index
      %c0_17 = arith.constant 0 : index
      %c0_18 = arith.constant 0 : index
      %29 = vector.load %arg4[%c0_16, %c0_17, %c0_18] : memref<1x1x128xf32, #tpu.memory_space<vmem>>, vector<1x1x128xf32>
      tpu.vector_store %arg4[%c0_16, %c0_17, %c0_18], %28 {strides = array<i32>} : memref<1x1x128xf32, #tpu.memory_space<vmem>>, vector<1x1x128xf32>,
    } else {
    }
    return
  }
  func.func @transform_0(%arg0: i32, %arg1: i32) -> (i32, i32) {
    %c1_i32 = arith.constant 1 : i32
    %0 = arith.muli %arg0, %c1_i32 : i32
    %1 = arith.addi %0, %arg1 : i32
    %c0_i32 = arith.constant 0 : i32
    %c0_i32_0 = arith.constant 0 : i32
    return %1, %c0_i32 : i32, i32
  }
  func.func @transform_1(%arg0: i32, %arg1: i32) -> (i32, i32) {
    %c1_i32 = arith.constant 1 : i32
    %0 = arith.muli %arg0, %c1_i32 : i32
    %1 = arith.addi %0, %arg1 : i32
    %c0_i32 = arith.constant 0 : i32
    %c0_i32_0 = arith.constant 0 : i32
    return %1, %c0_i32 : i32, i32
  }
  func.func @transform_2(%arg0: i32, %arg1: i32) -> (i32, i32, i32) {
    %c0_i32 = arith.constant 0 : i32
    %c0_i32_0 = arith.constant 0 : i32
    %c0_i32_1 = arith.constant 0 : i32
    return %arg0, %c0_i32, %c0_i32_0 : i32, i32, i32
  }
}

</mosaic_0001>

<bundles_post_ra>
// kernel: tpu_custom_call.1
= control target key start
LH: loop header
LB: loop body
LE: loop exit
PB: predicated region body
PF: predicated region fallthrough
CT: control target
= control target key end

     0   :  { %7 = vsyncpa [#allocation4], 0  ;;  %s275_s0 = inlined_call_operand.hbm [shape: f32[8,512], index: 0, kind: input, shape index: {}]   ;;  %s276_s1 = inlined_call_operand.hbm [shape: f32[8,512], index: 1, kind: input, shape index: {}]   ;;  %s277_s2 = inlined_call_operand.hbm [shape: f32[1,1,128], index: 2, kind: output, shape index: {}]  }
   0x1   :  { %8 = vsyncpa [#allocation7], 0 }
   0x2   :  { %9 = vsyncpa [#allocation5], 0  ;;  %s221_s9 = smov [#allocation3]   ;;  %s222_s11 = smov [#allocation6]  }
   0x3   :  { %s20_s10 = sshll.u32 %s221_s9, 4  ;;  %s34_s12 = sshll.u32 %s222_s11, 4  ;;  %s21_s10 = int_to_ptr.vmem [resolvable:$true] %s20_s10  ;;  %s35_s12 = int_to_ptr.vmem [resolvable:$true] %s34_s12 }
   0x4   :  { %s149_s15 = scalar_lea.hbm %s275_s0, 512 }
   0x5   :  { %p150_p0 = scmp.ne.s32.totalorder %s275_s0, %s149_s15  ;;  %p153_p1 = scmp.lt.u32.totalorder %s149_s15, %s275_s0 }
   0x7   :  { %p155_p2 = pnand %p153_p1, %p150_p0 }
   0x9   :  { %158 = shalt.err (!%p155_p2)
}
   0xa   :  { %s159_s20 = scalar_lea.vmem %s21_s10, 512  ;;  %p164_p4 = scmp.lt.s32.totalorder %s21_s10, %s21_s10 }
   0xb   :  { %p160_p3 = scmp.ne.s32.totalorder %s21_s10, %s159_s20  ;;  %p165_p5 = scmp.lt.s32.totalorder %s159_s20, %s159_s20 }
   0xd   :  { %p166_p6 = por %p165_p5, %p164_p4 }
   0xf   :  { %p167_p7 = pnand %p166_p6, %p160_p3 }
  0x11   :  { %170 = shalt.err (!%p167_p7)
}
  0x12   :  { %23 = dma.hbm_to_vmem [thread:$0]  %s275_s0, 512, %s21_s10, [#allocation4]  }
  0x13   :  { %s171_s25 = scalar_lea.hbm %s276_s1, 512 }
  0x14   :  { %p172_p8 = scmp.ne.s32.totalorder %s276_s1, %s171_s25  ;;  %p175_p9 = scmp.lt.u32.totalorder %s171_s25, %s276_s1 }
  0x16   :  { %p177_p10 = pnand %p175_p9, %p172_p8 }
  0x18   :  { %180 = shalt.err (!%p177_p10)
}
  0x19   :  { %s181_s30 = scalar_lea.vmem %s35_s12, 512  ;;  %p186_p12 = scmp.lt.s32.totalorder %s35_s12, %s35_s12 }
  0x1a   :  { %p182_p11 = scmp.ne.s32.totalorder %s35_s12, %s181_s30  ;;  %p187_p13 = scmp.lt.s32.totalorder %s181_s30, %s181_s30 }
  0x1c   :  { %p188_p0 = por %p187_p13, %p186_p12 }
  0x1e   :  { %p189_p1 = pnand %p188_p0, %p182_p11 }
  0x20   :  { %192 = shalt.err (!%p189_p1)
}
  0x21   :  { %37 = dma.hbm_to_vmem [thread:$0]  %s276_s1, 512, %s35_s12, [#allocation7]  }
  0x22   :  { %215 = dma.done.wait [#allocation4], 512  }
  0x23   :  { %216 = vsyncadd [#allocation4], 4294966784 }
  0x24   :  { %217 = dma.done.wait [#allocation7], 512  }
  0x25   :  { %218 = vsyncadd [#allocation7], 4294966784  ;;  %v54_v0 = vld [vmem:[#allocation3] sm:$0xff]  ;;  %v55_v1 = vld [vmem:[#allocation3 + $0x8] sm:$0xff]  ;;  %s223_s1 = smov [#allocation8]  }
  0x26   :  { %v56_v2 = vld [vmem:[#allocation3 + $0x10] sm:$0xff]  ;;  %v57_v3 = vld [vmem:[#allocation3 + $0x18] sm:$0xff]  ;;  %v58_v4 = vld [vmem:[#allocation6] sm:$0xff]  ;;  %s130_s4 = sshll.u32 %s223_s1, 4  ;;  %s131_s4 = int_to_ptr.vmem [resolvable:$true] %s130_s4 }
  0x27   :  { %v59_v5 = vld [vmem:[#allocation6 + $0x8] sm:$0xff]  ;;  %v60_v6 = vld [vmem:[#allocation6 + $0x10] sm:$0xff]  ;;  %v61_v7 = vld [vmem:[#allocation6 + $0x18] sm:$0xff]  ;;  %v62_v8 = vsub.f32 %v54_v0, %v58_v4  ;;  %s193_s6 = scalar_lea.vmem %s131_s4, 16  ;;  %s197_s7 = scalar_lea.vmem %s131_s4, 32 }
  0x28   :  { %v63_v9 = vsub.f32 %v55_v1, %v59_v5  ;;  %v64_v10 = vsub.f32 %v56_v2, %v60_v6  ;;  %v65_v11 = vsub.f32 %v57_v3, %v61_v7  ;;  %p194_p2 = scmp.ne.s32.totalorder %s131_s4, %s193_s6  ;;  %p198_p3 = scmp.lt.s32.totalorder %s131_s4, %s131_s4 }
  0x29   :  { %v66_v12 = vand.u32 2147483647, %v62_v8  ;;  %v74_v14 = vmul.f32 %v62_v8, %v62_v8  ;;  %p199_p4 = scmp.lt.s32.totalorder %s197_s7, %s193_s6 }
  0x2a   :  { %v67_v13 = vand.u32 2147483647, %v63_v9  ;;  %v75_v15 = vmul.f32 %v63_v9, %v63_v9  ;;  %v68_v16 = vand.u32 2147483647, %v64_v10  ;;  %v69_v17 = vand.u32 2147483647, %v65_v11 }
  0x2b   :  { %v76_v18 = vmul.f32 %v64_v10, %v64_v10  ;;  %v77_v19 = vmul.f32 %v65_v11, %v65_v11  ;;  %vm70_vm0 = vcmp.lt.f32.partialorder %v66_v12, 0.75  ;;  %v78_v20 = vmul.f32 0.6666667, %v74_v14  ;;  %p200_p5 = por %p199_p4, %p198_p3 }
  0x2c   :  { %v79_v21 = vmul.f32 0.6666667, %v75_v15  ;;  %vm71_vm1 = vcmp.lt.f32.partialorder %v67_v13, 0.75  ;;  %vm72_vm2 = vcmp.lt.f32.partialorder %v68_v16, 0.75  ;;  %v140_v24 = vadd.f32 -0.375, %v66_v12 }
  0x2d   :  { %v80_v22 = vmul.f32 0.6666667, %v76_v18  ;;  %v81_v23 = vmul.f32 0.6666667, %v77_v19  ;;  %v141_v25 = vadd.f32 -0.375, %v67_v13  ;;  %v142_v26 = vadd.f32 -0.375, %v68_v16  ;;  %p201_p6 = pnand %p200_p5, %p194_p2 }
  0x2e   :  { %v143_v27 = vadd.f32 -0.375, %v69_v17  ;;  %vm73_vm3 = vcmp.lt.f32.partialorder %v69_v17, 0.75  ;;  %v86_v28 = vsel %vm70_vm0, %v78_v20, %v140_v24 }
  0x2f   :  { %v87_v29 = vsel %vm71_vm1, %v79_v21, %v141_v25  ;;  %v88_v30 = vsel %vm72_vm2, %v80_v22, %v142_v26 }
  0x30   :  { %v109_v31 = vadd.f32 %v87_v29, %v86_v28  ;;  %v89_v32 = vsel %vm73_vm3, %v81_v23, %v143_v27 }
  0x32   :  { %v110_v33 = vadd.f32 %v109_v31, %v88_v30 }
  0x34   :  { %v111_v34 = vadd.f32 %v110_v33, %v89_v32 }
  0x36   :  { %112 = vadd.xlane.f32.xlu0 %v111_v34 }
  0xc3   :  { %v113_v35 = vpop.xlane.xlu0 %112 }
  0xc4   :  { %v114_v36 = vrot.slane %v113_v35, 4 }
  0xc6   :  { %v115_v37 = vadd.f32 %v114_v36, %v113_v35 }
  0xc8   :  { %v116_v38 = vrot.slane %v115_v37, 2 }
  0xca   :  { %v117_v39 = vadd.f32 %v116_v38, %v115_v37 }
  0xcc   :  { %v118_v40 = vrot.slane %v117_v39, 1 }
  0xce   :  { %v119_v41 = vadd.f32 %v118_v40, %v117_v39 }
  0xd0   :  { %144 = vpush %v119_v41 }
 0x101   :  { %s145_s5 = spop %144 }
 0x102   :  { %v121_v42 = vstv %s145_s5 }
 0x103   :  { %123 = vst [vmem:[#allocation8] sm:$0x1] %v121_v42 }
 0x104   :  { %204 = shalt.err (!%p201_p6)
}
 0x105   :  { %s205_s10 = scalar_lea.hbm %s277_s2, 16 }
 0x106   :  { %p206_p7 = scmp.ne.s32.totalorder %s277_s2, %s205_s10  ;;  %p209_p8 = scmp.lt.u32.totalorder %s205_s10, %s277_s2 }
 0x108   :  { %p211_p9 = pnand %p209_p8, %p206_p7 }
 0x10a   :  { %214 = shalt.err (!%p211_p9)
}
 0x10b   :  { %133 = dma.vmem_to_hbm [thread:$0]  %s131_s4, 16, %s277_s2, [#allocation5]  }
 0x10c   :  { %219 = dma.done.wait [#allocation5], 16  }
 0x10d   :  { %220 = vsyncadd [#allocation5], 4294967280 }
 0x10e   :  { %137 = vsyncpa [#allocation4], 1 }
 0x10f   :  { %138 = vsyncpa [#allocation7], 1 }
 0x110   :  { %139 = vsyncpa [#allocation5], 1 }

</bundles_post_ra>
